<compile_context>
chip_gen: v6e
topology: v6e:2x2x1
jax: 0.10.0
libtpu: 0.0.40
codegen_flags: <defaults>
</compile_context>

<pallas_src>
import math

import jax
import jax.numpy as jnp
from jax import lax
from jax.experimental import pallas as pl
from jax.experimental.pallas import tpu as pltpu

LANE = 128
_NEG_BIG = -1.0e15  # same masking constant as the PyTorch module


def _round_up(x, m):
    return (x + m - 1) // m * m


# ---------------------------------------------------------------------------
# Pass 1: projection + per-node attention scores.
# ---------------------------------------------------------------------------
def _proj_kernel(ba_ref, h_ref, w_ref, bw_ref, a1_ref, a2t_ref,
                 hh_ref, s1_ref, s2_ref):
    # h_hat = h @ W + bW   (bf16 operands, f32 accumulation on the MXU)
    hh = jnp.dot(h_ref[...], w_ref[...],
                 preferred_element_type=jnp.float32) + bw_ref[...]
    # s1 = h_hat @ a1 + ba   -> [bq, 1] column (ba folded in from SMEM scalar)
    s1_ref[...] = jnp.dot(hh, a1_ref[...],
                          preferred_element_type=jnp.float32) + ba_ref[0]
    # s2 = a2^T contracted with h_hat on the feature axis -> [1, bq] row,
    # so the attention kernel never needs a transpose.
    s2_ref[...] = lax.dot_general(
        a2t_ref[...], hh,
        dimension_numbers=(((1,), (1,)), ((), ())),
        preferred_element_type=jnp.float32)
    hh_ref[...] = hh.astype(hh_ref.dtype)


# ---------------------------------------------------------------------------
# Pass 2: flash-style masked softmax attention + aggregation.
# ---------------------------------------------------------------------------
def _make_attn_kernel(alpha, concat, block_k, n_k_tiles, hh_resident):
    """alpha = LeakyReLU slope (0<alpha<1), concat = apply ELU (both static)."""

    def kernel(occ_ref, s1_ref, s2_ref, mask_ref, hh_ref, o_ref, m_sc, l_sc):
        i = pl.program_id(0)
        j = pl.program_id(1)

        @pl.when(j == 0)
        def _():
            m_sc[...] = jnp.full_like(m_sc, -jnp.inf)
            l_sc[...] = jnp.zeros_like(l_sc)
            o_ref[...] = jnp.zeros_like(o_ref)   # resident accumulator (f32)

        # Skip tiles whose mask block is entirely zero (scalar-prefetched
        # occupancy). Skipping is exact: such a tile contributes nothing after
        # the online-softmax correction anyway.
        @pl.when(occ_ref[i * n_k_tiles + j] != 0)
        def _():
            # e[q,k] = s1[q] + s2[k]; LeakyReLU via mul+max (valid for 0<alpha<1)
            e = s1_ref[...] + s2_ref[...]            # [bq,1]+[1,bk] -> [bq,bk]
            e = jnp.maximum(e, alpha * e)
            # integer mask compare (no int8 -> f32 convert pass)
            logits = jnp.where(mask_ref[...] != 0, e, jnp.float32(_NEG_BIG))

            # Online softmax update (f32 throughout).
            m_prev = m_sc[...]
            m_new = jnp.maximum(m_prev, jnp.max(logits, axis=1, keepdims=True))
            corr = jnp.exp(m_prev - m_new)
            p = jnp.exp(logits - m_new)              # [bq, bk]
            l_sc[...] = corr * l_sc[...] + jnp.sum(p, axis=1, keepdims=True)

            if hh_resident:
                start = pl.multiple_of(j * block_k, block_k)
                hh_tile = hh_ref[pl.ds(start, block_k), :]
            else:
                hh_tile = hh_ref[...]

            # accumulate directly into the resident output block
            o_ref[...] = corr * o_ref[...] + jnp.dot(
                p.astype(hh_tile.dtype), hh_tile,
                preferred_element_type=jnp.float32)
            m_sc[...] = m_new

        @pl.when(j == pl.num_programs(1) - 1)
        def _():
            l = l_sc[...]
            inv_l = jnp.where(l > 0.0, pl.reciprocal(l, approx=True),
                              jnp.zeros_like(l))
            res = o_ref[...] * inv_l
            if concat:
                # ELU with an expm1 that stays accurate near zero (Taylor for
                # small |x|) without relying on an expm1 lowering.
                neg = jnp.where(
                    res > -0.1,
                    res * (1.0 + res * (0.5 + res * (1.0 / 6.0))),
                    jnp.exp(res) - 1.0)
                res = jnp.where(res > 0, res, neg)
            o_ref[...] = res.astype(o_ref.dtype)

    return kernel


# ---------------------------------------------------------------------------
# Wrapper: pick tiles, pad to TPU shapes, run the two pallas_calls, slice.
# ---------------------------------------------------------------------------
def gat_layer_pallas(h, attn_mask, W, bW, a1, a2, ba, *, alpha, concat,
                     block_q=2 * LANE, block_k=4 * LANE):
    N, F_in = h.shape
    F_out = W.shape[1]
    f32 = jnp.float32

    n_pad = _round_up(N, LANE)
    f_in_pad = _round_up(F_in, LANE)
    f_out_pad = _round_up(F_out, LANE)
    m_tiles = n_pad // LANE

    # --- tile-size selection (perf feedback): largest divisors of n_pad so no
    #     extra padding, block_k up to 512, block_q up to 256, and keep >= 2
    #     steps on the parallel query axis when possible (v7x megacore). ---
    def _divisors_desc(cap):
        return [d for d in range(min(cap, m_tiles), 0, -1) if m_tiles % d == 0]

    dk = _divisors_desc(max(1, block_k // LANE))[0]
    dq_cands = _divisors_desc(max(1, block_q // LANE))
    dq = dq_cands[0]
    for d in dq_cands:
        if m_tiles // d >= 2:
            dq = d
            break
    block_k = dk * LANE
    block_q = dq * LANE
    n_q_tiles = n_pad // block_q
    n_k_tiles = n_pad // block_k

    # pass-1 query block: up to 512, same >= 2 step preference
    dq1_cands = _divisors_desc(4)
    dq1 = dq1_cands[0]
    for d in dq1_cands:
        if m_tiles // d >= 2:
            dq1 = d
            break
    block_q1 = dq1 * LANE

    # Keep h_hat fully VMEM-resident in pass 2 when it comfortably fits
    # (allow 2x for buffer allocation); otherwise stream (block_k, f_out) tiles.
    hh_resident = (2 * n_pad * f_out_pad * 2) <= 12 * 1024 * 1024

    # Pad everything to lane/sublane-friendly shapes; matmul operands -> bf16.
    h_p = jnp.zeros((n_pad, f_in_pad), f32).at[:N, :F_in].set(h).astype(jnp.bfloat16)
    w_p = jnp.zeros((f_in_pad, f_out_pad), f32).at[:F_in, :F_out].set(W).astype(jnp.bfloat16)
    bw_p = jnp.zeros((1, f_out_pad), f32).at[:, :F_out].set(bW)
    a1_p = jnp.zeros((f_out_pad, 1), f32).at[:F_out, :].set(a1)
    a2t_p = jnp.zeros((1, f_out_pad), f32).at[:, :F_out].set(a2.T)
    mask_p = jnp.zeros((n_pad, n_pad), jnp.int8).at[:N, :N].set(
        (attn_mask > 0).astype(jnp.int8))
    ba_s = jnp.asarray(ba, f32).reshape((1,))

    # Per-(i,j) tile occupancy for mask-tile skipping (scalar prefetch, SMEM 1D).
    occ = (mask_p.reshape(n_q_tiles, block_q, n_k_tiles, block_k) != 0
           ).any(axis=(1, 3)).reshape(-1).astype(jnp.int32)

    # 48 MiB: below v7x's 64 MiB VMEM with headroom; plenty on v5e/v6e (128 MiB).
    vmem_limit = 48 * 1024 * 1024

    # ---- pass 1: projection + attention scores ----
    hh, s1, s2 = pl.pallas_call(
        _proj_kernel,
        out_shape=(
            jax.ShapeDtypeStruct((n_pad, f_out_pad), jnp.bfloat16),  # h_hat
            jax.ShapeDtypeStruct((n_pad, 1), jnp.float32),           # s1 column
            jax.ShapeDtypeStruct((1, n_pad), jnp.float32),           # s2 row
        ),
        grid_spec=pltpu.PrefetchScalarGridSpec(
            num_scalar_prefetch=0,
            grid=(n_pad // block_q1,),
            in_specs=[
                pl.BlockSpec(memory_space=pltpu.MemorySpace.SMEM),       # ba
                pl.BlockSpec((block_q1, f_in_pad), lambda i: (i, 0)),    # h
                pl.BlockSpec((f_in_pad, f_out_pad), lambda i: (0, 0)),   # W
                pl.BlockSpec((1, f_out_pad), lambda i: (0, 0)),          # bW
                pl.BlockSpec((f_out_pad, 1), lambda i: (0, 0)),          # a1
                pl.BlockSpec((1, f_out_pad), lambda i: (0, 0)),          # a2^T
            ],
            out_specs=(
                pl.BlockSpec((block_q1, f_out_pad), lambda i: (i, 0)),   # h_hat
                pl.BlockSpec((block_q1, 1), lambda i: (i, 0)),           # s1
                pl.BlockSpec((1, block_q1), lambda i: (0, i)),           # s2
            ),
        ),
        compiler_params=pltpu.CompilerParams(
            dimension_semantics=("parallel",),
            vmem_limit_bytes=vmem_limit),
    )(ba_s, h_p, w_p, bw_p, a1_p, a2t_p)

    # ---- pass 2: tiled masked softmax + aggregation (flash style) ----
    if hh_resident:
        hh_spec = pl.BlockSpec((n_pad, f_out_pad), lambda i, j, occ_r: (0, 0))
    else:
        hh_spec = pl.BlockSpec((block_k, f_out_pad), lambda i, j, occ_r: (j, 0))

    out_p = pl.pallas_call(
        _make_attn_kernel(alpha, concat, block_k, n_k_tiles, hh_resident),
        out_shape=jax.ShapeDtypeStruct((n_pad, f_out_pad), jnp.float32),
        grid_spec=pltpu.PrefetchScalarGridSpec(
            num_scalar_prefetch=1,
            grid=(n_q_tiles, n_k_tiles),
            in_specs=[
                pl.BlockSpec((block_q, 1), lambda i, j, occ_r: (i, 0)),        # s1
                pl.BlockSpec((1, block_k), lambda i, j, occ_r: (0, j)),        # s2
                pl.BlockSpec((block_q, block_k), lambda i, j, occ_r: (i, j)),  # mask i8
                hh_spec,                                                       # h_hat
            ],
            out_specs=pl.BlockSpec((block_q, f_out_pad),
                                   lambda i, j, occ_r: (i, 0)),
            scratch_shapes=[
                pltpu.VMEM((block_q, 1), jnp.float32),   # running max
                pltpu.VMEM((block_q, 1), jnp.float32),   # running denom
            ],
        ),
        compiler_params=pltpu.CompilerParams(
            dimension_semantics=("parallel", "arbitrary"),
            vmem_limit_bytes=vmem_limit),
    )(occ, s1, s2, mask_p, hh)

    return out_p[:N, :F_out]


# ---------------------------------------------------------------------------
# Pure-JAX reference mirroring the PyTorch forward (eval mode, f32).
# ---------------------------------------------------------------------------
def _reference(h, attn_mask, W, bW, a1, a2, ba, *, alpha, concat):
    h_hat = h @ W + bW
    e = h_hat @ a1 + (h_hat @ a2).T + ba[0, 0]
    e = jnp.where(e > 0, e, alpha * e)
    logits = jnp.where(attn_mask > 0, e, _NEG_BIG)
    attn = jax.nn.softmax(logits, axis=1)
    res = attn @ h_hat
    return jax.nn.elu(res) if concat else res


def _xavier_uniform(key, shape, gain):
    fan_out, fan_in = shape[0], shape[1]
    bound = gain * math.sqrt(6.0 / (fan_in + fan_out))
    return jax.random.uniform(key, shape, jnp.float32, -bound, bound)


if __name__ == "__main__":
    # Module hyper-params
    in_feature, out_feature = 16, 32
    dropout, alpha, concat = 0.5, 0.2, True
    N = 200  # number of nodes (exercises a 2x1 attention grid after padding)

    key = jax.random.PRNGKey(0)
    k_h, k_m, k_w, k_wb, k_a, k_ab = jax.random.split(key, 6)

    # Inputs (add self-loops so every node has at least one neighbor)
    h = jax.random.normal(k_h, (N, in_feature), jnp.float32)
    adj = (jax.random.uniform(k_m, (N, N)) > 0.5).astype(jnp.float32)
    attn_mask = jnp.maximum(adj, jnp.eye(N, dtype=jnp.float32))

    # Parameters (deterministic init mirroring the module's __init__ shapes)
    W_pt = _xavier_uniform(k_w, (out_feature, in_feature), gain=1.414)  # Linear.weight
    bW = jax.random.uniform(k_wb, (1, out_feature), jnp.float32,
                            -1.0 / math.sqrt(in_feature), 1.0 / math.sqrt(in_feature))
    a_pt = _xavier_uniform(k_a, (1, 2 * out_feature), gain=1.414)       # a.weight
    ba = jax.random.uniform(k_ab, (1, 1), jnp.float32,
                            -1.0 / math.sqrt(2 * out_feature),
                            1.0 / math.sqrt(2 * out_feature))

    W = W_pt.T                    # [in_feature, out_feature]
    a1 = a_pt[:, :out_feature].T  # [out_feature, 1]
    a2 = a_pt[:, out_feature:].T  # [out_feature, 1]

    out = gat_layer_pallas(h, attn_mask, W, bW, a1, a2, ba,
                           alpha=alpha, concat=concat)
    out = jax.block_until_ready(out)

    ref = _reference(h, attn_mask, W, bW, a1, a2, ba, alpha=alpha, concat=concat)
    assert out.shape == ref.shape
    assert bool(jnp.all(jnp.isfinite(out))), "non-finite values in kernel output"
    # bf16 MXU operands -> tolerance loosened vs the f32 reference.
    max_err = float(jnp.max(jnp.abs(out - ref)))
    assert jnp.allclose(out, ref, atol=5e-2, rtol=5e-2), (
        f"mismatch vs reference, max abs err = {max_err}")

    print("KERNEL_OK")
</pallas_src>

<mosaic_0001>
module attributes {stable_mosaic.version = 11 : i64} {
  func.func @_proj_kernel(%arg0: i32, %arg1: memref<1xf32, #tpu.memory_space<smem>>, %arg2: memref<128x128xbf16, #tpu.memory_space<vmem>>, %arg3: memref<128x128xbf16, #tpu.memory_space<vmem>>, %arg4: memref<1x128xf32, #tpu.memory_space<vmem>>, %arg5: memref<128x1xf32, #tpu.memory_space<vmem>>, %arg6: memref<1x128xf32, #tpu.memory_space<vmem>>, %arg7: memref<128x128xbf16, #tpu.memory_space<vmem>>, %arg8: memref<128x1xf32, #tpu.memory_space<vmem>>, %arg9: memref<1x128xf32, #tpu.memory_space<vmem>>) attributes {dimension_semantics = [#tpu.dimension_semantics<parallel>], iteration_bounds = array<i64: 2>, scalar_prefetch = 0 : i64, scratch_operands = 0 : i64, tpu.core_type = #tpu.core_type<tc>, window_params = [{transform_indices = @transform_0, window_bounds = array<i64: 1>}, {transform_indices = @transform_1, window_bounds = array<i64: 128, 128>}, {pipeline_mode = #tpu.pipeline_mode<synchronous>, transform_indices = @transform_2, window_bounds = array<i64: 128, 128>}, {pipeline_mode = #tpu.pipeline_mode<synchronous>, transform_indices = @transform_3, window_bounds = array<i64: 1, 128>}, {pipeline_mode = #tpu.pipeline_mode<synchronous>, transform_indices = @transform_4, window_bounds = array<i64: 128, 1>}, {pipeline_mode = #tpu.pipeline_mode<synchronous>, transform_indices = @transform_5, window_bounds = array<i64: 1, 128>}, {transform_indices = @transform_6, window_bounds = array<i64: 128, 128>}, {transform_indices = @transform_7, window_bounds = array<i64: 128, 1>}, {transform_indices = @transform_8, window_bounds = array<i64: 1, 128>}]} {
    %c0 = arith.constant 0 : index
    %c0_0 = arith.constant 0 : index
    %0 = vector.load %arg2[%c0, %c0_0] : memref<128x128xbf16, #tpu.memory_space<vmem>>, vector<128x128xbf16>
    %c0_1 = arith.constant 0 : index
    %c0_2 = arith.constant 0 : index
    %1 = vector.load %arg3[%c0_1, %c0_2] : memref<128x128xbf16, #tpu.memory_space<vmem>>, vector<128x128xbf16>
    %cst = arith.constant dense<0.000000e+00> : vector<128x128xf32>
    %2 = tpu.matmul %0, %1, %cst {dimension_numbers = #tpu.dot_dimension_numbers<[1], [0], [0], [1], [0, 0, 1, 1], [], []>} : vector<128x128xbf16>, vector<128x128xbf16>, vector<128x128xf32> -> vector<128x128xf32>
    %c0_3 = arith.constant 0 : index
    %c0_4 = arith.constant 0 : index
    %3 = vector.load %arg4[%c0_3, %c0_4] : memref<1x128xf32, #tpu.memory_space<vmem>>, vector<1x128xf32>
    %4 = vector.broadcast %3 : vector<1x128xf32> to vector<128x128xf32>
    %5 = arith.addf %2, %4 : vector<128x128xf32>
    %c0_5 = arith.constant 0 : index
    %c0_6 = arith.constant 0 : index
    %6 = vector.load %arg5[%c0_5, %c0_6] : memref<128x1xf32, #tpu.memory_space<vmem>>, vector<128x1xf32>
    %cst_7 = arith.constant dense<0.000000e+00> : vector<128x1xf32>
    %7 = tpu.matmul %5, %6, %cst_7 {dimension_numbers = #tpu.dot_dimension_numbers<[1], [0], [0], [1], [0, 0, 1, 1], [], []>} : vector<128x128xf32>, vector<128x1xf32>, vector<128x1xf32> -> vector<128x1xf32>
    %c0_8 = arith.constant 0 : index
    %8 = memref.load %arg1[%c0_8] : memref<1xf32, #tpu.memory_space<smem>>
    %9 = vector.broadcast %8 : f32 to vector<128x1xf32>
    %10 = arith.addf %7, %9 : vector<128x1xf32>
    %c0_9 = arith.constant 0 : index
    %c0_10 = arith.constant 0 : index
    %11 = vector.load %arg8[%c0_9, %c0_10] : memref<128x1xf32, #tpu.memory_space<vmem>>, vector<128x1xf32>
    tpu.vector_store %arg8[%c0_9, %c0_10], %10 {strides = array<i32>} : memref<128x1xf32, #tpu.memory_space<vmem>>, vector<128x1xf32>,
    %c0_11 = arith.constant 0 : index
    %c0_12 = arith.constant 0 : index
    %12 = vector.load %arg6[%c0_11, %c0_12] : memref<1x128xf32, #tpu.memory_space<vmem>>, vector<1x128xf32>
    %cst_13 = arith.constant dense<0.000000e+00> : vector<1x128xf32>
    %13 = tpu.matmul %12, %5, %cst_13 {dimension_numbers = #tpu.dot_dimension_numbers<[1], [1], [0], [0], [0, 0, 1, 0], [], []>} : vector<1x128xf32>, vector<128x128xf32>, vector<1x128xf32> -> vector<1x128xf32>
    %c0_14 = arith.constant 0 : index
    %c0_15 = arith.constant 0 : index
    %14 = vector.load %arg9[%c0_14, %c0_15] : memref<1x128xf32, #tpu.memory_space<vmem>>, vector<1x128xf32>
    tpu.vector_store %arg9[%c0_14, %c0_15], %13 {strides = array<i32>} : memref<1x128xf32, #tpu.memory_space<vmem>>, vector<1x128xf32>,
    %15 = arith.truncf %5 : vector<128x128xf32> to vector<128x128xbf16>
    %c0_16 = arith.constant 0 : index
    %c0_17 = arith.constant 0 : index
    %16 = vector.load %arg7[%c0_16, %c0_17] : memref<128x128xbf16, #tpu.memory_space<vmem>>, vector<128x128xbf16>
    tpu.vector_store %arg7[%c0_16, %c0_17], %15 {strides = array<i32>} : memref<128x128xbf16, #tpu.memory_space<vmem>>, vector<128x128xbf16>,
    return
  }
  func.func @transform_0(%arg0: i32) -> i32 {
    %c0_i32 = arith.constant 0 : i32
    %c0_i32_0 = arith.constant 0 : i32
    return %c0_i32 : i32
  }
  func.func @transform_1(%arg0: i32) -> (i32, i32) {
    %c0_i32 = arith.constant 0 : i32
    %c0_i32_0 = arith.constant 0 : i32
    return %arg0, %c0_i32 : i32, i32
  }
  func.func @transform_2(%arg0: i32) -> (i32, i32) {
    %c0_i32 = arith.constant 0 : i32
    %c0_i32_0 = arith.constant 0 : i32
    %c0_i32_1 = arith.constant 0 : i32
    return %c0_i32, %c0_i32_0 : i32, i32
  }
  func.func @transform_3(%arg0: i32) -> (i32, i32) {
    %c0_i32 = arith.constant 0 : i32
    %c0_i32_0 = arith.constant 0 : i32
    %c0_i32_1 = arith.constant 0 : i32
    return %c0_i32, %c0_i32_0 : i32, i32
  }
  func.func @transform_4(%arg0: i32) -> (i32, i32) {
    %c0_i32 = arith.constant 0 : i32
    %c0_i32_0 = arith.constant 0 : i32
    %c0_i32_1 = arith.constant 0 : i32
    return %c0_i32, %c0_i32_0 : i32, i32
  }
  func.func @transform_5(%arg0: i32) -> (i32, i32) {
    %c0_i32 = arith.constant 0 : i32
    %c0_i32_0 = arith.constant 0 : i32
    %c0_i32_1 = arith.constant 0 : i32
    return %c0_i32, %c0_i32_0 : i32, i32
  }
  func.func @transform_6(%arg0: i32) -> (i32, i32) {
    %c0_i32 = arith.constant 0 : i32
    %c0_i32_0 = arith.constant 0 : i32
    return %arg0, %c0_i32 : i32, i32
  }
  func.func @transform_7(%arg0: i32) -> (i32, i32) {
    %c0_i32 = arith.constant 0 : i32
    %c0_i32_0 = arith.constant 0 : i32
    return %arg0, %c0_i32 : i32, i32
  }
  func.func @transform_8(%arg0: i32) -> (i32, i32) {
    %c0_i32 = arith.constant 0 : i32
    %c0_i32_0 = arith.constant 0 : i32
    return %c0_i32, %arg0 : i32, i32
  }
}

</mosaic_0001>

<bundles_post_ra>
// kernel: tpu_custom_call.1
= control target key start
LH: loop header
LB: loop body
LE: loop exit
PB: predicated region body
PF: predicated region fallthrough
CT: control target
= control target key end

     0   :  { %s1950_s0 = inlined_call_operand.<no memory space> [shape: f32[1], index: 0, kind: input, shape index: {}]   ;;  %s1951_s1 = inlined_call_operand.vmem [shape: bf16[256,128], index: 1, kind: input, shape index: {}]   ;;  %s1952_s2 = inlined_call_operand.hbm [shape: bf16[128,128], index: 2, kind: input, shape index: {}]   ;;  %s1953_s3 = inlined_call_operand.vmem [shape: f32[1,128], index: 3, kind: input, shape index: {}]   ;;  %s1954_s4 = inlined_call_operand.vmem [shape: f32[128,1], index: 4, kind: input, shape index: {}]   ;;  %s1955_s5 = inlined_call_operand.vmem [shape: f32[1,128], index: 5, kind: input, shape index: {}]   ;;  %s1956_s6 = inlined_call_operand.hbm [shape: bf16[256,128], index: 6, kind: output, shape index: {0}]   ;;  %s1957_s7 = inlined_call_operand.vmem [shape: f32[256,1], index: 7, kind: output, shape index: {1}]   ;;  %s1958_s8 = inlined_call_operand.hbm [shape: f32[1,256], index: 8, kind: output, shape index: {2}]  }
   0x1   :  { %14 = sst [smem:[#allocation2]] %s1950_s0 }
   0x2   :  { %15 = vsyncpa [#allocation4], 0 }
   0x3   :  { %16 = vsyncpa [#allocation5], 0 }
   0x4   :  { %18 = vsyncpa [#allocation5 + $0x1], 0 }
   0x5   :  { %19 = vsyncpa [#allocation8], 0 }
   0x6   :  { %21 = vsyncpa [#allocation8 + $0x1], 0  ;;  %s1636_s29 = smov 0   ;;  %s1638_s30 = smov 0  }
   0x7   :  { %s1640_s9 = smov 0   ;;  %s1642_s10 = smov 0  }
   0x8 LB: > { %s1657_s0 = sadd.s32 4294967295, %s1577_s10   ;;  %s1078_s11 = sadd.s32 4294967294, %s1577_s10   ;;  %s1577_s10 = sphi %s1642_s10, %s1966_s10   ;;  %s1573_s9 = sphi %s1640_s9, %s1965_s9   ;;  %s1569_s30 = sphi %s1638_s30, %s1964_s30   ;;  %s1565_s29 = sphi %s1636_s29, %s1963_s29  }
   0x9   : > { %s1661_s12 = sadd.s32 1, %s1577_s10   ;;  %s165_s13 = sadd.s32 1, %s1573_s9 }
   0xa   : > { %s162_s14 = ssub.s32 %s1577_s10, %s1661_s12  ;;  %p175_p0 = scmp.ne.s32.totalorder %s1573_s9, %s1569_s30 }
   0xb   : > { %p163_p1 = scmp.eq.s32.totalorder %s162_s14, 0  ;;  %p176_p2 = scmp.eq.s32.totalorder %s1657_s0, 1 }
   0xc   : > { %p181_p3 = scmp.ne.s32.totalorder %s1569_s30, %s1565_s29  ;;  %p182_p4 = scmp.eq.s32.totalorder %s1078_s11, 1 }
   0xd   : > { %s1672_s15 = scalar_select %p163_p1, %s1573_s9, %s165_s13  }
   0xe   : > { %p1674_p5 = por %p176_p2, %p175_p0  ;;  %p1678_p6 = por %p182_p4, %p181_p3 }
   0xf   : > { %p1079_p7 = scmp.ge.s32.totalorder %s1577_s10, 1  ;;  %p241_p8 = scmp.lt.s32.totalorder %s1577_s10, 3 }
  0x10   : > { %s1960_s17 = scalar_select %p1678_p6, 1, 0 }
  0x11   : > { %p1399_p9 = scmp.eq.s32.totalorder %s1657_s0, 0  ;;  %p1685_p10 = pnand %p1079_p7, %p241_p8 }
  0x12   : > { %s1579_s19 = smov [#allocation3]  }
  0x13   : > { %s256_s20 = sshll.u32 %s1579_s19, 4  ;;  %p1388_p11 = pneg %p1685_p10  ;;  %s257_s20 = int_to_ptr.vmem [resolvable:$true] %s256_s20 }
  0x14   : > { %s1468_s21 = scalar_lea.vmem %s257_s20, 1024  ;;  %p1476_p3 = scmp.lt.s32.totalorder %s257_s20, %s257_s20 }
  0x15   : > { %p1389_p12 = pnand %p1399_p9, %p1388_p11  ;;  %p1469_p0 = scmp.ne.s32.totalorder %s257_s20, %s1468_s21 }
  0x16   : > { %p1477_p4 = scmp.lt.s32.totalorder %s1468_s21, %s1468_s21 }
  0x17   : > { %p1459_p13 = pneg %p1389_p12 }
  0x18   : > { %p1478_p6 = por %p1477_p4, %p1476_p3 }
  0x19   : > { %p1471_p1 = pnand %p1469_p0, %p1459_p13 }
  0x1b   : > { %p1472_p2 = pneg %p1471_p1 }
  0x1d   : > { %p1479_p7 = pnand %p1478_p6, %p1472_p2 }
  0x1f   : > { %1482 = shalt.err (!%p1479_p7)
}
  0x20   : > { %s1580_s22 = smov 64   ;;  %s1581_s23 = smov 4  }
  0x21   : > { %1391 = dma.hbm_to_vmem [thread:$0]  (!%p1389_p12), %s1952_s2, 1024, %s257_s20, [#allocation4], %s1580_s22, %s1580_s22, %s1581_s23  }
  0x22   : > { %290 = sbr.rel (%p1685_p10) target bundleno = 566 (0x236), region = 44 }
  0x27   : > { %1552 = dma.done.wait (%p1399_p9), [#allocation4], 1024  }
  0x28   : > { %1554 = vsyncadd (%p1399_p9), [#allocation4], 4294966272  ;;  %s1703_s26 = sshll.u32 %s1657_s0, 4  ;;  %v1441_v0 = vld [vmem:[#allocation3 + $0x38] sm:$0xff]   ;;  %v1442_v1 = vld [vmem:[#allocation3 + $0x30] sm:$0xff]   ;;  %v1582_v32 = vmov 0.0  }
  0x29   : > { %p334_p6 = scmp.lt.s32.totalorder %s1703_s26, 31  ;;  %1257 = vmatprep.subr.bf16.mxu1 %v1441_v0  ;;  %v1443_v2 = vld [vmem:[#allocation3 + $0x28] sm:$0xff]   ;;  %v1444_v3 = vld [vmem:[#allocation3 + $0x20] sm:$0xff]   ;;  %v1445_v5 = vld [vmem:[#allocation3 + $0x18] sm:$0xff]   ;;  %1345 = vmatprep.subr.mxu0 %v1582_v32  ;;  %vm1583_vm0 = vmmov 0   ;;  %s1774_s11 = sand.u32 1, %s1569_s30  }
  0x2a   : > { %1258 = vmatpush3.bf16.msra.mxu1 %v1441_v0  ;;  %v1446_v6 = vld [vmem:[#allocation3 + $0x10] sm:$0xff]   ;;  %v1447_v7 = vld [vmem:[#allocation3 + $0x8] sm:$0xff]   ;;  %v1448_v8 = vld [vmem:[#allocation3] sm:$0xff]   ;;  %1377 = vmatprep.mubr.msk.f32.mxu0 %vm1583_vm0, %v1582_v32  ;;  %s1084_s19 = sshll.u32 %s1774_s11, 6  ;;  %s1144_s24 = sshll.u32 %s1657_s0, 10 }
  0x2b   : > { %s1707_s27 = scalar_select %p334_p6, %s1703_s26, 31  ;;  %1259 = vmatprep.subr.bf16.mxu1 %v1442_v1  ;;  %v594_v9 = vld [vmem:[%s1954_s4 + $0x78] sm:$0xff]  ;;  %v593_v12 = vld [vmem:[%s1954_s4 + $0x70] sm:$0xff]  ;;  %v592_v13 = vld [vmem:[%s1954_s4 + $0x68] sm:$0xff] }
  0x2c   : > { %v591_v14 = vld [vmem:[%s1954_s4 + $0x60] sm:$0xff]  ;;  %v590_v17 = vld [vmem:[%s1954_s4 + $0x58] sm:$0xff]  ;;  %v589_v18 = vld [vmem:[%s1954_s4 + $0x50] sm:$0xff]  ;;  %s1794_s20 = scalar_lea.vmem [#allocation6], %s1084_s19  ;;  %s912_s13 = scalar_lea.sflag [#allocation5], %s1774_s11 }
  0x2d   : > { %s1086_s28 = sshll.u32 %s1707_s27, 2  ;;  %v588_v19 = vld [vmem:[%s1954_s4 + $0x48] sm:$0xff]  ;;  %v587_v20 = vld [vmem:[%s1954_s4 + $0x40] sm:$0xff]  ;;  %v586_v23 = vld [vmem:[%s1954_s4 + $0x38] sm:$0xff]  ;;  %s934_s23 = sshll.u32 %s1794_s20, 4  ;;  %s1834_s23 = int_to_ptr.vmem [resolvable:$true] %s934_s23 }
  0x2e   : > { %s1713_s14 = scalar_lea.vmem %s1951_s1, %s1086_s28  ;;  %1260 = vmatpush3.bf16.msra.mxu1 %v1442_v1  ;;  %v585_v24 = vld [vmem:[%s1954_s4 + $0x30] sm:$0xff]  ;;  %v584_v25 = vld [vmem:[%s1954_s4 + $0x28] sm:$0xff]  ;;  %v583_v26 = vld [vmem:[%s1954_s4 + $0x20] sm:$0xff]  ;;  %s1840_s28 = scalar_lea.hbm %s1956_s6, %s1144_s24 }
  0x2f   : > { %1261 = vmatprep.subr.bf16.mxu1 %v1443_v2  ;;  %v1449_v4 = vld [vmem:[%s1713_s14] sm:$0xff]   ;;  %v1450_v10 = vld [vmem:[%s1713_s14 + $0x8] sm:$0xff]   ;;  %v1451_v11 = vld [vmem:[%s1713_s14 + $0x10] sm:$0xff]   ;;  %s1483_s18 = scalar_lea.vmem %s1834_s23, 1024  ;;  %s1584_s19 = smov [#allocation6]  }
  0x30   : > { %1273 = vmatprep.mubr.bf16.mxu1 %v1449_v4  ;;  %v1452_v15 = vld [vmem:[%s1713_s14 + $0x18] sm:$0xff]   ;;  %v1453_v16 = vld [vmem:[%s1713_s14 + $0x20] sm:$0xff]   ;;  %v1454_v21 = vld [vmem:[%s1713_s14 + $0x28] sm:$0xff]   ;;  %p1484_p8 = scmp.ne.s32.totalorder %s1834_s23, %s1483_s18  ;;  %s1487_s21 = sshll.u32 %s1584_s19, 4  ;;  %s1488_s21 = int_to_ptr.vmem [resolvable:$false] %s1487_s21 }
  0x31   : > { %v1455_v22 = vld [vmem:[%s1713_s14 + $0x30] sm:$0xff]   ;;  %v1456_v27 = vld [vmem:[%s1713_s14 + $0x38] sm:$0xff]   ;;  %v580_v30 = vld [vmem:[%s1954_s4 + $0x8] sm:$0xff]  ;;  %p1490_p11 = scmp.lt.s32.totalorder %s1834_s23, %s1488_s21 }
  0x32   : > { %1262 = vmatpush3.bf16.msra.mxu1 %v1443_v2  ;;  %v582_v28 = vld [vmem:[%s1954_s4 + $0x18] sm:$0xff]  ;;  %v581_v29 = vld [vmem:[%s1954_s4 + $0x10] sm:$0xff]  ;;  %v579_v31 = vld [vmem:[%s1954_s4] sm:$0xff]  ;;  %p1485_p9 = pnand %p1484_p8, %p1674_p5 }
  0x33   : > { %1263 = vmatprep.subr.bf16.mxu1 %v1444_v3  ;;  %v1089_v34 = vld [vmem:[%s1953_s3] ss:$0 sm:$0xff] }
  0x34   : > { %p1486_p10 = pneg %p1485_p9 }
  0x36   : > { %1264 = vmatpush3.bf16.msra.mxu1 %v1444_v3 }
  0x37   : > { %1265 = vmatprep.subr.bf16.mxu1 %v1445_v5 }
  0x3a   : > { %1266 = vmatpush3.bf16.msra.mxu1 %v1445_v5 }
  0x3b   : > { %1267 = vmatprep.subr.bf16.mxu1 %v1446_v6 }
  0x3e   : > { %1268 = vmatpush3.bf16.msra.mxu1 %v1446_v6 }
  0x3f   : > { %1269 = vmatprep.subr.bf16.mxu1 %v1447_v7 }
  0x42   : > { %1270 = vmatpush3.bf16.msra.mxu1 %v1447_v7 }
  0x43   : > { %1271 = vmatprep.subr.bf16.mxu1 %v1448_v8 }
  0x46   : > { %1272 = vmatpush3.bf16.msra.mxu1 %v1448_v8 }
  0x47   : > { %1289 = vmatprep.subr.mxu1 %v594_v9 }
  0x49   : > { %1274 = vmatmul.mubr.bf16.vlgmr.msra.gmra.mxu1 %v1450_v10  ;;  %v759_v10 = vld [vmem:[%s1955_s5] sm:$0x1] }
  0x4a   : > { %1277 = vmatprep.mubr.bf16.mxu1 %v1451_v11  ;;  %1290 = vmatpush3.msra.mxu1 %v594_v9 }
  0x4b   : > { %1291 = vmatprep.subr.mxu1 %v593_v12 }
  0x4c   : > { %1292 = vmatpush3.msra.mxu1 %v593_v12 }
  0x4d   : > { %1293 = vmatprep.subr.mxu1 %v592_v13 }
  0x4e   : > { %1294 = vmatpush3.msra.mxu1 %v592_v13 }
  0x4f   : > { %1295 = vmatprep.subr.mxu1 %v591_v14 }
  0x50   : > { %1296 = vmatpush3.msra.mxu1 %v591_v14 }
  0x51   : > { %1278 = vmatmul.mubr.bf16.gmra.mxu1 %v1452_v15  ;;  %1297 = vmatprep.subr.mxu1 %v590_v17 }
  0x52   : > { %1281 = vmatprep.mubr.bf16.mxu1 %v1453_v16  ;;  %1298 = vmatpush3.msra.mxu1 %v590_v17 }
  0x53   : > { %1299 = vmatprep.subr.mxu1 %v589_v18 }
  0x54   : > { %1300 = vmatpush3.msra.mxu1 %v589_v18 }
  0x55   : > { %1301 = vmatprep.subr.mxu1 %v588_v19 }
  0x56   : > { %1302 = vmatpush3.msra.mxu1 %v588_v19 }
  0x57   : > { %1303 = vmatprep.subr.mxu1 %v587_v20 }
  0x58   : > { %1304 = vmatpush3.msra.mxu1 %v587_v20 }
  0x59   : > { %1282 = vmatmul.mubr.bf16.gmra.mxu1 %v1454_v21  ;;  %1305 = vmatprep.subr.mxu1 %v586_v23 }
  0x5a   : > { %1285 = vmatprep.mubr.bf16.mxu1 %v1455_v22  ;;  %1306 = vmatpush3.msra.mxu1 %v586_v23 }
  0x5b   : > { %1307 = vmatprep.subr.mxu1 %v585_v24 }
  0x5c   : > { %1308 = vmatpush3.msra.mxu1 %v585_v24 }
  0x5d   : > { %1309 = vmatprep.subr.mxu1 %v584_v25 }
  0x5e   : > { %1310 = vmatpush3.msra.mxu1 %v584_v25 }
  0x5f   : > { %1311 = vmatprep.subr.mxu1 %v583_v26 }
  0x60   : > { %1312 = vmatpush3.msra.mxu1 %v583_v26 }
  0x61   : > { %1286 = vmatmul.mubr.bf16.gmra.mxu1 %v1456_v27  ;;  %1313 = vmatprep.subr.mxu1 %v582_v28 }
  0x62   : > { %1314 = vmatpush3.msra.mxu1 %v582_v28 }
  0x63   : > { %1315 = vmatprep.subr.mxu1 %v581_v29 }
  0x64   : > { %1316 = vmatpush3.msra.mxu1 %v581_v29 }
  0x65   : > { %1317 = vmatprep.subr.mxu1 %v580_v30 }
  0x66   : > { %1318 = vmatpush3.msra.mxu1 %v580_v30 }
  0x67   : > { %1319 = vmatprep.subr.mxu1 %v579_v31 }
  0x68   : > { %1320 = vmatpush3.msra.mxu1 %v579_v31 }
 0x109   : > { %v1275_v33 = vpop.f32.mrf.mxu1 }
 0x10a   : > { %v1782_v38 = vadd.f32 %v1275_v33, %v1089_v34 }
 0x10b   : > { %v516_v35 = vpop.f32.mrf.mxu1 }
 0x10c   : > { %v1779_v36 = vadd.f32 %v1089_v34, %v516_v35 }
 0x10d   : > { %v1276_v37 = vpop.f32.mrf.mxu1 }
 0x10e   : > { %v1784_v39 = vadd.f32 %v1276_v37, %v1089_v34  ;;  %1321 = vmatprep.mubr.f32.mxu1 %v1779_v36 }
 0x10f   : > { %v519_v40 = vpop.f32.mrf.mxu1 }
 0x110   : > { %v1153_v41 = vpack.c.bf16 %v1784_v39, %v1782_v38  ;;  %v1789_v42 = vadd.f32 %v1089_v34, %v519_v40 }
 0x111   : > { %v1279_v43 = vpop.f32.mrf.mxu1 }
 0x112   : > { %v1148_v44 = vpack.c.bf16 %v1789_v42, %v1779_v36  ;;  %1322 = vmatmul.mubr.f32.vlgmr.msra.gmra.mxu1 %v1789_v42  ;;  %1185 = vst [vmem:[%s1794_s20 + $0x8] sm:$0xff] %v1153_v41   ;;  %v541_v48 = vadd.f32 %v1279_v43, %v1089_v34 }
 0x113   : > { %v532_v45 = vpop.f32.mrf.mxu1  ;;  %1324 = vmatprep.mubr.f32.mxu1 %v1782_v38 }
 0x114   : > { %v1798_v46 = vadd.f32 %v1089_v34, %v532_v45  ;;  %1149 = vst [vmem:[%s1794_s20] sm:$0xff] %v1148_v44  }
 0x115   : > { %v1280_v47 = vpop.f32.mrf.mxu1 }
 0x116   : > { %v544_v49 = vadd.f32 %v1280_v47, %v1089_v34  ;;  %1325 = vmatmul.mubr.f32.gmra.mxu1 %v1784_v39 }
 0x117   : > { %v535_v50 = vpop.f32.mrf.mxu1  ;;  %1327 = vmatprep.mubr.f32.mxu1 %v1798_v46 }
 0x118   : > { %v1163_v51 = vpack.c.bf16 %v544_v49, %v541_v48  ;;  %v536_v52 = vadd.f32 %v1089_v34, %v535_v50 }
 0x119   : > { %v1283_v53 = vpop.f32.mrf.mxu1 }
 0x11a   : > { %v1158_v54 = vpack.c.bf16 %v536_v52, %v1798_v46  ;;  %1328 = vmatmul.mubr.f32.gmra.mxu1 %v536_v52  ;;  %1187 = vst [vmem:[%s1794_s20 + $0x18] sm:$0xff] %v1163_v51   ;;  %v557_v58 = vadd.f32 %v1283_v53, %v1089_v34 }
 0x11b   : > { %v548_v55 = vpop.f32.mrf.mxu1  ;;  %1330 = vmatprep.mubr.f32.mxu1 %v541_v48 }
 0x11c   : > { %v549_v56 = vadd.f32 %v1089_v34, %v548_v55  ;;  %1186 = vst [vmem:[%s1794_s20 + $0x10] sm:$0xff] %v1158_v54  }
 0x11d   : > { %v1284_v57 = vpop.f32.mrf.mxu1 }
 0x11e   : > { %v560_v59 = vadd.f32 %v1284_v57, %v1089_v34  ;;  %1331 = vmatmul.mubr.f32.gmra.mxu1 %v544_v49 }
 0x11f   : > { %v551_v60 = vpop.f32.mrf.mxu1  ;;  %1333 = vmatprep.mubr.f32.mxu1 %v549_v56 }
 0x120   : > { %v1173_v61 = vpack.c.bf16 %v560_v59, %v557_v58  ;;  %v552_v62 = vadd.f32 %v1089_v34, %v551_v60 }
 0x121   : > { %v1287_v63 = vpop.f32.mrf.mxu1 }
 0x122   : > { %v1168_v0 = vpack.c.bf16 %v552_v62, %v549_v56  ;;  %1334 = vmatmul.mubr.f32.gmra.mxu1 %v552_v62  ;;  %1189 = vst [vmem:[%s1794_s20 + $0x28] sm:$0xff] %v1173_v61   ;;  %v573_v4 = vadd.f32 %v1287_v63, %v1089_v34 }
 0x123   : > { %v564_v1 = vpop.f32.mrf.mxu1  ;;  %1336 = vmatprep.mubr.f32.mxu1 %v557_v58 }
 0x124   : > { %v565_v2 = vadd.f32 %v1089_v34, %v564_v1  ;;  %1188 = vst [vmem:[%s1794_s20 + $0x20] sm:$0xff] %v1168_v0  }
 0x125   : > { %v1288_v3 = vpop.f32.mrf.mxu1 }
 0x126   : > { %v576_v5 = vadd.f32 %v1288_v3, %v1089_v34  ;;  %1337 = vmatmul.mubr.f32.gmra.mxu1 %v560_v59 }
 0x127   : > { %v567_v6 = vpop.f32.mrf.mxu1  ;;  %1339 = vmatprep.mubr.f32.mxu1 %v565_v2 }
 0x128   : > { %v1183_v7 = vpack.c.bf16 %v576_v5, %v573_v4  ;;  %v568_v8 = vadd.f32 %v1089_v34, %v567_v6  ;;  %1346 = vmatpush3.xpose.msra.mxu0 %v576_v5 }
 0x129   : > { %1347 = vmatprep.subr.mxu0 %v1582_v32 }
 0x12a   : > { %v1178_v9 = vpack.c.bf16 %v568_v8, %v565_v2  ;;  %1340 = vmatmul.mubr.f32.gmra.mxu1 %v568_v8  ;;  %1191 = vst [vmem:[%s1794_s20 + $0x38] sm:$0xff] %v1183_v7  }
 0x12b   : > { %1342 = vmatprep.mubr.f32.mxu1 %v573_v4 }
 0x12c   : > { %1348 = vmatpush3.xpose.msra.mxu0 %v573_v4  ;;  %1190 = vst [vmem:[%s1794_s20 + $0x30] sm:$0xff] %v1178_v9   ;;  %s1489_s20 = scalar_lea.vmem %s1488_s21, 2048 }
 0x12d   : > { %1349 = vmatprep.subr.mxu0 %v1582_v32  ;;  %p1491_p12 = scmp.lt.s32.totalorder %s1489_s20, %s1483_s18 }
 0x12e   : > { %1343 = vmatmul.mubr.f32.gmra.mxu1 %v576_v5 }
 0x12f   : > { %p1492_p13 = por %p1491_p12, %p1490_p11 }
 0x130   : > { %1350 = vmatpush3.xpose.msra.mxu0 %v568_v8 }
 0x131   : > { %1351 = vmatprep.subr.mxu0 %v1582_v32  ;;  %p1493_p0 = pnand %p1492_p13, %p1486_p10 }
 0x134   : > { %1352 = vmatpush3.xpose.msra.mxu0 %v565_v2 }
 0x135   : > { %1353 = vmatprep.subr.mxu0 %v1582_v32 }
 0x138   : > { %1354 = vmatpush3.xpose.msra.mxu0 %v560_v59 }
 0x139   : > { %1355 = vmatprep.subr.mxu0 %v1582_v32 }
 0x13c   : > { %1356 = vmatpush3.xpose.msra.mxu0 %v557_v58 }
 0x13d   : > { %1357 = vmatprep.subr.mxu0 %v1582_v32 }
 0x140   : > { %1358 = vmatpush3.xpose.msra.mxu0 %v552_v62 }
 0x141   : > { %1359 = vmatprep.subr.mxu0 %v1582_v32 }
 0x144   : > { %1360 = vmatpush3.xpose.msra.mxu0 %v549_v56 }
 0x145   : > { %1361 = vmatprep.subr.mxu0 %v1582_v32 }
 0x148   : > { %1362 = vmatpush3.xpose.msra.mxu0 %v544_v49 }
 0x149   : > { %1363 = vmatprep.subr.mxu0 %v1582_v32 }
 0x14c   : > { %1364 = vmatpush3.xpose.msra.mxu0 %v541_v48 }
 0x14d   : > { %1365 = vmatprep.subr.mxu0 %v1582_v32 }
 0x150   : > { %1366 = vmatpush3.xpose.msra.mxu0 %v536_v52 }
 0x151   : > { %1367 = vmatprep.subr.mxu0 %v1582_v32 }
 0x154   : > { %1368 = vmatpush3.xpose.msra.mxu0 %v1798_v46 }
 0x155   : > { %1369 = vmatprep.subr.mxu0 %v1582_v32 }
 0x158   : > { %1370 = vmatpush3.xpose.msra.mxu0 %v1784_v39 }
 0x159   : > { %1371 = vmatprep.subr.mxu0 %v1582_v32 }
 0x15c   : > { %1372 = vmatpush3.xpose.msra.mxu0 %v1782_v38 }
 0x15d   : > { %1373 = vmatprep.subr.mxu0 %v1582_v32 }
 0x160   : > { %1374 = vmatpush3.xpose.msra.mxu0 %v1789_v42 }
 0x161   : > { %1375 = vmatprep.subr.mxu0 %v1582_v32 }
 0x164   : > { %1376 = vmatpush3.xpose.msra.mxu0 %v1779_v36 }
 0x167   : > { %1378 = vmatmul.mubr.f32.vlgmr.msra.gmra.mxu0 %v759_v10 }
 0x168   : > { %1496 = shalt.err (!%p1493_p0)
}
 0x169   : > { %s1497_s0 = scalar_lea.hbm %s1840_s28, 1024  ;;  %s1501_s14 = scalar_lea.hbm %s1956_s6, 2048 }
 0x16a   : > { %p1498_p1 = scmp.ne.s32.totalorder %s1840_s28, %s1497_s0  ;;  %p1502_p4 = scmp.lt.s32.totalorder %s1840_s28, %s1956_s6 }
 0x16b   : > { %p1503_p7 = scmp.lt.s32.totalorder %s1501_s14, %s1497_s0 }
 0x16c   : > { %p1499_p2 = pnand %p1498_p1, %p1674_p5 }
 0x16d   : > { %p1504_p6 = por %p1503_p7, %p1502_p4 }
 0x16e   : > { %p1500_p3 = pneg %p1499_p2 }
 0x170   : > { %p1505_p8 = pnand %p1504_p6, %p1500_p3 }
 0x172   : > { %1508 = shalt.err (!%p1505_p8)
}
 0x173   : > { %s1585_s18 = smov 64   ;;  %s1586_s21 = smov 4   ;;  %vm742_vm1 = vcmask 7168  }
 0x174   : > { %1384 = dma.vmem_to_hbm [thread:$0]  (%p1674_p5), %s1834_s23, 1024, %s1840_s28, %s912_s13, %s1585_s18, %s1585_s18, %s1586_s21  }
 0x175   : > { %s595_s20 = sld [smem:[#allocation2]]  ;;  %s1088_s22 = sshll.u32 %s1707_s27, 3 }
 0x176   : > { %s1869_s0 = scalar_lea.vmem %s1957_s7, %s1088_s22  ;;  %s332_s27 = scalar_lea.vmem [#allocation7], %s1774_s11 }
 0x177   : > { %s954_s23 = sshll.u32 %s332_s27, 4  ;;  %s1910_s14 = scalar_lea.hbm %s1958_s8, %s1703_s26  ;;  %s1904_s23 = int_to_ptr.vmem [resolvable:$true] %s954_s23 }
 0x178   : > { %s922_s19 = scalar_lea.sflag [#allocation8], %s1774_s11  ;;  %s1509_s18 = scalar_lea.vmem %s1904_s23, 16 }
 0x179   : > { %p1510_p9 = scmp.ne.s32.totalorder %s1904_s23, %s1509_s18  ;;  %s1587_s21 = smov [#allocation7]  }
 0x17b   : > { %v596_v11 = vstv %s595_s20  ;;  %p1511_p10 = pnand %p1510_p9, %p1674_p5  ;;  %s1513_s20 = sshll.u32 %s1587_s21, 4  ;;  %s1514_s20 = int_to_ptr.vmem [resolvable:$false] %s1513_s20 }
 0x17c   : > { %s1515_s22 = scalar_lea.vmem %s1514_s20, 32  ;;  %p1516_p12 = scmp.lt.s32.totalorder %s1904_s23, %s1514_s20 }
 0x17d   : > { %p1512_p11 = pneg %p1511_p10  ;;  %p1517_p13 = scmp.lt.s32.totalorder %s1515_s22, %s1509_s18 }
 0x17f   : > { %p1518_p0 = por %p1517_p13, %p1516_p12 }
 0x181   : > { %p1519_p1 = pnand %p1518_p0, %p1512_p11 }
 0x1d2   : > { %v1323_v12 = vpop.f32.mrf.mxu1 }
 0x1d3   : > { %v669_v13 = vadd.f32 %v1323_v12, %v596_v11 }
 0x1d4   : > { %v663_v14 = vpop.f32.mrf.mxu1 }
 0x1d5   : > { %744 = vst.msk [vmem:[%s1869_s0 + $0x8] sm:$0xff] %vm742_vm1, %v669_v13  ;;  %v664_v15 = vadd.f32 %v663_v14, %v596_v11 }
 0x1d6   : > { %v1326_v16 = vpop.f32.mrf.mxu1 }
 0x1d7   : > { %743 = vst.msk [vmem:[%s1869_s0] sm:$0xff] %vm742_vm1, %v664_v15  ;;  %v679_v17 = vadd.f32 %v1326_v16, %v596_v11 }
 0x1d8   : > { %v673_v18 = vpop.f32.mrf.mxu1 }
 0x1d9   : > { %746 = vst.msk [vmem:[%s1869_s0 + $0x18] sm:$0xff] %vm742_vm1, %v679_v17  ;;  %v674_v19 = vadd.f32 %v673_v18, %v596_v11 }
 0x1da   : > { %v1329_v20 = vpop.f32.mrf.mxu1 }
 0x1db   : > { %745 = vst.msk [vmem:[%s1869_s0 + $0x10] sm:$0xff] %vm742_vm1, %v674_v19  ;;  %v689_v21 = vadd.f32 %v1329_v20, %v596_v11 }
 0x1dc   : > { %v683_v22 = vpop.f32.mrf.mxu1 }
 0x1dd   : > { %748 = vst.msk [vmem:[%s1869_s0 + $0x28] sm:$0xff] %vm742_vm1, %v689_v21  ;;  %v684_v23 = vadd.f32 %v683_v22, %v596_v11 }
 0x1de   : > { %v1332_v24 = vpop.f32.mrf.mxu1 }
 0x1df   : > { %747 = vst.msk [vmem:[%s1869_s0 + $0x20] sm:$0xff] %vm742_vm1, %v684_v23  ;;  %v699_v25 = vadd.f32 %v1332_v24, %v596_v11 }
 0x1e0   : > { %v693_v26 = vpop.f32.mrf.mxu1 }
 0x1e1   : > { %750 = vst.msk [vmem:[%s1869_s0 + $0x38] sm:$0xff] %vm742_vm1, %v699_v25  ;;  %v694_v27 = vadd.f32 %v693_v26, %v596_v11 }
 0x1e2   : > { %v1335_v28 = vpop.f32.mrf.mxu1 }
 0x1e3   : > { %749 = vst.msk [vmem:[%s1869_s0 + $0x30] sm:$0xff] %vm742_vm1, %v694_v27  ;;  %v709_v29 = vadd.f32 %v1335_v28, %v596_v11 }
 0x1e4   : > { %v703_v30 = vpop.f32.mrf.mxu1 }
 0x1e5   : > { %752 = vst.msk [vmem:[%s1869_s0 + $0x48] sm:$0xff] %vm742_vm1, %v709_v29  ;;  %v704_v31 = vadd.f32 %v703_v30, %v596_v11 }
 0x1e6   : > { %v1338_v32 = vpop.f32.mrf.mxu1 }
 0x1e7   : > { %751 = vst.msk [vmem:[%s1869_s0 + $0x40] sm:$0xff] %vm742_vm1, %v704_v31  ;;  %v719_v33 = vadd.f32 %v1338_v32, %v596_v11 }
 0x1e8   : > { %v713_v34 = vpop.f32.mrf.mxu1 }
 0x1e9   : > { %754 = vst.msk [vmem:[%s1869_s0 + $0x58] sm:$0xff] %vm742_vm1, %v719_v33  ;;  %v714_v35 = vadd.f32 %v713_v34, %v596_v11 }
 0x1ea   : > { %v1341_v36 = vpop.f32.mrf.mxu1 }
 0x1eb   : > { %753 = vst.msk [vmem:[%s1869_s0 + $0x50] sm:$0xff] %vm742_vm1, %v714_v35  ;;  %v729_v37 = vadd.f32 %v1341_v36, %v596_v11 }
 0x1ec   : > { %v723_v38 = vpop.f32.mrf.mxu1 }
 0x1ed   : > { %756 = vst.msk [vmem:[%s1869_s0 + $0x68] sm:$0xff] %vm742_vm1, %v729_v37  ;;  %v724_v39 = vadd.f32 %v723_v38, %v596_v11 }
 0x1ee   : > { %v1344_v40 = vpop.f32.mrf.mxu1 }
 0x1ef   : > { %755 = vst.msk [vmem:[%s1869_s0 + $0x60] sm:$0xff] %vm742_vm1, %v724_v39  ;;  %v739_v41 = vadd.f32 %v1344_v40, %v596_v11 }
 0x1f0   : > { %v733_v42 = vpop.f32.mrf.mxu1 }
 0x1f1   : > { %758 = vst.msk [vmem:[%s1869_s0 + $0x78] sm:$0xff] %vm742_vm1, %v739_v41  ;;  %v734_v43 = vadd.f32 %v733_v42, %v596_v11 }
 0x1f3   : > { %757 = vst.msk [vmem:[%s1869_s0 + $0x70] sm:$0xff] %vm742_vm1, %v734_v43 }
 0x227   : > { %v826_v44 = vpop.f32.mrf.mxu0 }
 0x228   : > { %830 = vst [vmem:[%s332_s27] sm:$0x1] %v826_v44 }
 0x229   : > { %v1379_v45 = vpop.f32.mrf.mxu0 }
 0x22a   : > { %1522 = shalt.err (!%p1519_p1)
}
 0x22b   : > { %s1523_s26 = scalar_lea.hbm %s1910_s14, 16  ;;  %s1527_s25 = scalar_lea.hbm %s1958_s8, 32 }
 0x22c   : > { %p1524_p2 = scmp.ne.s32.totalorder %s1910_s14, %s1523_s26  ;;  %p1528_p7 = scmp.lt.s32.totalorder %s1910_s14, %s1958_s8 }
 0x22d   : > { %p1529_p6 = scmp.lt.s32.totalorder %s1527_s25, %s1523_s26 }
 0x22e   : > { %p1525_p3 = pnand %p1524_p2, %p1674_p5 }
 0x22f   : > { %p1530_p8 = por %p1529_p6, %p1528_p7 }
 0x230   : > { %p1526_p4 = pneg %p1525_p3 }
 0x232   : > { %p1531_p9 = pnand %p1530_p8, %p1526_p4 }
 0x234   : > { %1534 = shalt.err (!%p1531_p9)
}
 0x235   : > { %1385 = dma.vmem_to_hbm [thread:$0]  (%p1674_p5), %s1904_s23, 16, %s1910_s14, %s922_s19  }
 0x236 PF: > { %p1401_p10 = scmp.ge.s32.totalorder %s1577_s10, 2  ;;  %s966_s28 = sand.u32 1, %s1565_s29  }
 0x237   : > { %p1962_p11 = scmp.ne.s32.totalorder %s1960_s17, 0  ;;  %s967_s13 = scalar_lea.sflag [#allocation5], %s966_s28 }
 0x239   : > { %p1393_p12 = pnand %p1401_p10, %p1962_p11 }
 0x23b   : > { %p1394_p13 = pneg %p1393_p12 }
 0x23d   : > { %1556 = dma.done.wait (%p1394_p13), %s967_s13, 1024  }
 0x23e   : > { %1558 = vsyncadd (%p1394_p13), %s967_s13, 4294966272  ;;  %s984_s18 = scalar_lea.sflag [#allocation8], %s966_s28 }
 0x23f   : > { %1560 = dma.done.wait (%p1394_p13), %s984_s18, 16  }
 0x240   : > { %1562 = vsyncadd (%p1394_p13), %s984_s18, 4294967280  ;;  %p24_p5 = scmp.ge.s32.totalorder %s1661_s12, 4   ;;  %s1963_s29 = smov %s1569_s30 }
 0x241   : > { %s1964_s30 = smov %s1573_s9  ;;  %s1965_s9 = smov %s1672_s15 }
 0x242   : > { %s1966_s10 = smov %s1661_s12  ;;  %26 = sbr.rel (!%p24_p5) target bundleno = 8 (0x8), region = 113 }
 0x247   :  { %988 = vsyncpa [#allocation4], 1 }
 0x248   :  { %990 = vsyncpa [#allocation4 + $0x1], 1 }
 0x249   :  { %991 = vsyncpa [#allocation5], 1 }
 0x24a   :  { %993 = vsyncpa [#allocation5 + $0x1], 1 }
 0x24b   :  { %994 = vsyncpa [#allocation8], 1 }
 0x24c   :  { %996 = vsyncpa [#allocation8 + $0x1], 1 }

</bundles_post_ra>
